<compile_context>
chip_gen: v6e
topology: v6e:2x2x1
jax: 0.10.0
libtpu: 0.0.40
codegen_flags: <defaults>
</compile_context>

<pallas_src>
import math

import jax
import jax.numpy as jnp
from jax.experimental import pallas as pl
from jax.experimental.pallas import tpu as pltpu


LANES = 128  # lane-dense feature padding target


def _round_up(n, m):
    return ((n + m - 1) // m) * m


# ----------------------------- Pallas kernel -----------------------------

def dqn_noisy_kernel(x_ref, w_ref, b_ref, out_ref):
    """x_ref: (bt, 128), w_ref: (3, 128, 128), b_ref: (8, 128), out_ref: (bt, 128)."""
    x = x_ref[...]

    # fc1 + ReLU
    h = jnp.dot(x, w_ref[0], preferred_element_type=jnp.float32) + b_ref[0:1, :]
    h = jnp.maximum(h, 0.0)

    # fc2 + ReLU
    h = jnp.dot(h, w_ref[1], preferred_element_type=jnp.float32) + b_ref[1:2, :]
    h = jnp.maximum(h, 0.0)

    # fc3 (no activation)
    q = jnp.dot(h, w_ref[2], preferred_element_type=jnp.float32) + b_ref[2:3, :]

    out_ref[...] = q.astype(out_ref.dtype)


def dqn_noisy_forward(x, w_slab, b_slab, action_size, *, batch_tile=512):
    """x: (batch, state_size) f32. w_slab: (3, 128, 128). b_slab: (8, 128)."""
    batch, state = x.shape
    feat = w_slab.shape[-1]

    # Pad batch to a multiple of 8 sublanes; tile it if large (weights stay resident).
    bpad = _round_up(batch, 8)
    if bpad > batch_tile:
        bt = batch_tile
        bpad = _round_up(bpad, bt)
    else:
        bt = bpad

    x_pad = jnp.zeros((bpad, feat), jnp.float32).at[:batch, :state].set(
        x.astype(jnp.float32))

    out_pad = pl.pallas_call(
        dqn_noisy_kernel,
        out_shape=jax.ShapeDtypeStruct((bpad, feat), jnp.float32),
        grid=(bpad // bt,),
        in_specs=[
            pl.BlockSpec((bt, feat), lambda i: (i, 0)),          # activations: tiled over batch
            pl.BlockSpec((3, feat, feat), lambda i: (0, 0, 0)),  # weight slab: resident
            pl.BlockSpec((8, feat), lambda i: (0, 0)),           # bias slab: resident
        ],
        out_specs=pl.BlockSpec((bt, feat), lambda i: (i, 0)),
        compiler_params=pltpu.CompilerParams(
            dimension_semantics=("parallel",)),                  # megacore sharding on v7x
    )(x_pad, w_slab, b_slab)

    return out_pad[:batch, :action_size]


# ----------------- parameter / noise init (plain-JAX glue) -----------------

def _scale_noise(key, size):
    # PyTorch: x = randn(size); sign(x) * sqrt(|x|)
    x = jax.random.normal(key, (size,), dtype=jnp.float32)
    return jnp.sign(x) * jnp.sqrt(jnp.abs(x))


def _init_noisy_layer(key, in_features, out_features, std_init):
    k_wmu, k_bmu, k_ein, k_eout = jax.random.split(key, 4)
    mu_range = 1.0 / math.sqrt(in_features)

    # Stored as (in, out): transpose of PyTorch's (out, in), so forward is x @ W + b.
    w_mu = jax.random.uniform(k_wmu, (in_features, out_features),
                              minval=-mu_range, maxval=mu_range, dtype=jnp.float32)
    w_sigma = jnp.full((in_features, out_features),
                       std_init / math.sqrt(in_features), dtype=jnp.float32)
    b_mu = jax.random.uniform(k_bmu, (out_features,),
                              minval=-mu_range, maxval=mu_range, dtype=jnp.float32)
    b_sigma = jnp.full((out_features,),
                       std_init / math.sqrt(out_features), dtype=jnp.float32)

    # TODO(synk): noise uses JAX PRNG (same factorized-Gaussian distribution), not torch's RNG stream.
    eps_in = _scale_noise(k_ein, in_features)     # (in,)
    eps_out = _scale_noise(k_eout, out_features)  # (out,)
    w_eps = eps_in[:, None] * eps_out[None, :]    # (in, out) == outer(eps_out, eps_in).T
    b_eps = eps_out                               # (out,)

    return dict(w_mu=w_mu, w_sigma=w_sigma, w_eps=w_eps,
                b_mu=b_mu, b_sigma=b_sigma, b_eps=b_eps)


def init_noisy_params(key, state_size, action_size,
                      fc1_units=64, fc2_units=64, noisy_std=0.4):
    k1, k2, k3 = jax.random.split(key, 3)
    layers = (_init_noisy_layer(k1, state_size, fc1_units, noisy_std),
              _init_noisy_layer(k2, fc1_units, fc2_units, noisy_std),
              _init_noisy_layer(k3, fc2_units, action_size, noisy_std))
    params = {}
    for i, layer in enumerate(layers, start=1):
        for name, val in layer.items():
            params[f"{name[:1]}{i}_{name[2:]}"] = val  # w1_mu, b1_sigma, ...
    return params


def compose_and_pack(params, feat=LANES):
    """Compose effective (training-mode) weights/biases once per noise resample and
    pack them into one zero-padded (3, feat, feat) weight slab + (8, feat) bias slab."""
    w_rows, b_rows = [], []
    for i in (1, 2, 3):
        w = params[f"w{i}_mu"] + params[f"w{i}_sigma"] * params[f"w{i}_eps"]   # (in, out)
        b = params[f"b{i}_mu"] + params[f"b{i}_sigma"] * params[f"b{i}_eps"]   # (out,)
        n_in, n_out = w.shape
        w_rows.append(jnp.zeros((feat, feat), jnp.float32).at[:n_in, :n_out].set(w))
        b_rows.append(jnp.zeros((feat,), jnp.float32).at[:n_out].set(b))
    w_slab = jnp.stack(w_rows)                                                 # (3, feat, feat)
    b_slab = jnp.zeros((8, feat), jnp.float32).at[:3, :].set(jnp.stack(b_rows))  # (8, feat)
    return w_slab, b_slab


def reference_forward(x, p):
    """Pure-JAX reference (training-mode NoisyLinear) on the UNPADDED params."""
    hi = jax.lax.Precision.HIGHEST

    def noisy(h, i):
        w = p[f"w{i}_mu"] + p[f"w{i}_sigma"] * p[f"w{i}_eps"]
        b = p[f"b{i}_mu"] + p[f"b{i}_sigma"] * p[f"b{i}_eps"]
        return jnp.dot(h, w, precision=hi) + b[None, :]

    h = jnp.maximum(noisy(x, 1), 0.0)
    h = jnp.maximum(noisy(h, 2), 0.0)
    return noisy(h, 3)


if __name__ == "__main__":
    # Shapes consistent with the module: state_size=8, fc1=fc2=64, action_size=4.
    state_size, action_size = 8, 4
    key = jax.random.PRNGKey(0)
    k_params, k_x, k_xbig = jax.random.split(key, 3)

    params = init_noisy_params(k_params, state_size, action_size,
                               fc1_units=64, fc2_units=64, noisy_std=0.4)
    # Noise composition hoisted: done once per reset_noise(), outside the hot kernel path.
    w_slab, b_slab = compose_and_pack(params)

    # Small per-step batch (exercise the single-tile path).
    x_small = jax.random.normal(k_x, (2, state_size), dtype=jnp.float32)
    out_small = jax.block_until_ready(dqn_noisy_forward(x_small, w_slab, b_slab, action_size))
    ref_small = reference_forward(x_small, params)
    assert out_small.shape == (2, action_size)
    assert jnp.allclose(out_small, ref_small, atol=1e-4, rtol=1e-5), "mismatch (small batch)"

    # Training-style batch (exercise the batch grid + resident weights path).
    x_big = jax.random.normal(k_xbig, (1024, state_size), dtype=jnp.float32)
    out_big = jax.block_until_ready(dqn_noisy_forward(x_big, w_slab, b_slab, action_size))
    ref_big = reference_forward(x_big, params)
    assert out_big.shape == (1024, action_size)
    assert jnp.allclose(out_big, ref_big, atol=1e-4, rtol=1e-5), "mismatch (large batch)"

    print("KERNEL_OK")
</pallas_src>

<mosaic_0001>
module attributes {stable_mosaic.version = 11 : i64} {
  func.func @dqn_noisy_kernel(%arg0: i32, %arg1: memref<8x128xf32, #tpu.memory_space<vmem>>, %arg2: memref<3x128x128xf32, #tpu.memory_space<vmem>>, %arg3: memref<8x128xf32, #tpu.memory_space<vmem>>, %arg4: memref<8x128xf32, #tpu.memory_space<vmem>>) attributes {dimension_semantics = [#tpu.dimension_semantics<parallel>], iteration_bounds = array<i64: 1>, scalar_prefetch = 0 : i64, scratch_operands = 0 : i64, tpu.core_type = #tpu.core_type<tc>, window_params = [{transform_indices = @transform_0, window_bounds = array<i64: 8, 128>}, {pipeline_mode = #tpu.pipeline_mode<synchronous>, transform_indices = @transform_1, window_bounds = array<i64: 3, 128, 128>}, {pipeline_mode = #tpu.pipeline_mode<synchronous>, transform_indices = @transform_2, window_bounds = array<i64: 8, 128>}, {transform_indices = @transform_3, window_bounds = array<i64: 8, 128>}]} {
    %c0 = arith.constant 0 : index
    %c0_0 = arith.constant 0 : index
    %0 = vector.load %arg1[%c0, %c0_0] : memref<8x128xf32, #tpu.memory_space<vmem>>, vector<8x128xf32>
    %c0_1 = arith.constant 0 : index
    %c0_2 = arith.constant 0 : index
    %c0_3 = arith.constant 0 : index
    %1 = vector.load %arg2[%c0_1, %c0_2, %c0_3] : memref<3x128x128xf32, #tpu.memory_space<vmem>>, vector<1x128x128xf32>
    %2 = vector.shape_cast %1 : vector<1x128x128xf32> to vector<128x128xf32>
    %cst = arith.constant dense<0.000000e+00> : vector<8x128xf32>
    %3 = tpu.matmul %0, %2, %cst {dimension_numbers = #tpu.dot_dimension_numbers<[1], [0], [0], [1], [0, 0, 1, 1], [], []>} : vector<8x128xf32>, vector<128x128xf32>, vector<8x128xf32> -> vector<8x128xf32>
    %c0_4 = arith.constant 0 : index
    %c0_5 = arith.constant 0 : index
    %4 = vector.load %arg3[%c0_4, %c0_5] : memref<8x128xf32, #tpu.memory_space<vmem>>, vector<1x128xf32>
    %5 = vector.broadcast %4 : vector<1x128xf32> to vector<8x128xf32>
    %6 = arith.addf %3, %5 : vector<8x128xf32>
    %cst_6 = arith.constant 0.000000e+00 : f32
    %7 = vector.broadcast %cst_6 : f32 to vector<8x128xf32>
    %8 = arith.maximumf %6, %7 : vector<8x128xf32>
    %c1 = arith.constant 1 : index
    %c0_7 = arith.constant 0 : index
    %c0_8 = arith.constant 0 : index
    %9 = vector.load %arg2[%c1, %c0_7, %c0_8] : memref<3x128x128xf32, #tpu.memory_space<vmem>>, vector<1x128x128xf32>
    %10 = vector.shape_cast %9 : vector<1x128x128xf32> to vector<128x128xf32>
    %cst_9 = arith.constant dense<0.000000e+00> : vector<8x128xf32>
    %11 = tpu.matmul %8, %10, %cst_9 {dimension_numbers = #tpu.dot_dimension_numbers<[1], [0], [0], [1], [0, 0, 1, 1], [], []>} : vector<8x128xf32>, vector<128x128xf32>, vector<8x128xf32> -> vector<8x128xf32>
    %c1_10 = arith.constant 1 : index
    %c0_11 = arith.constant 0 : index
    %12 = vector.load %arg3[%c1_10, %c0_11] : memref<8x128xf32, #tpu.memory_space<vmem>>, vector<1x128xf32>
    %13 = vector.broadcast %12 : vector<1x128xf32> to vector<8x128xf32>
    %14 = arith.addf %11, %13 : vector<8x128xf32>
    %cst_12 = arith.constant 0.000000e+00 : f32
    %15 = vector.broadcast %cst_12 : f32 to vector<8x128xf32>
    %16 = arith.maximumf %14, %15 : vector<8x128xf32>
    %c2 = arith.constant 2 : index
    %c0_13 = arith.constant 0 : index
    %c0_14 = arith.constant 0 : index
    %17 = vector.load %arg2[%c2, %c0_13, %c0_14] : memref<3x128x128xf32, #tpu.memory_space<vmem>>, vector<1x128x128xf32>
    %18 = vector.shape_cast %17 : vector<1x128x128xf32> to vector<128x128xf32>
    %cst_15 = arith.constant dense<0.000000e+00> : vector<8x128xf32>
    %19 = tpu.matmul %16, %18, %cst_15 {dimension_numbers = #tpu.dot_dimension_numbers<[1], [0], [0], [1], [0, 0, 1, 1], [], []>} : vector<8x128xf32>, vector<128x128xf32>, vector<8x128xf32> -> vector<8x128xf32>
    %c2_16 = arith.constant 2 : index
    %c0_17 = arith.constant 0 : index
    %20 = vector.load %arg3[%c2_16, %c0_17] : memref<8x128xf32, #tpu.memory_space<vmem>>, vector<1x128xf32>
    %21 = vector.broadcast %20 : vector<1x128xf32> to vector<8x128xf32>
    %22 = arith.addf %19, %21 : vector<8x128xf32>
    %c0_18 = arith.constant 0 : index
    %c0_19 = arith.constant 0 : index
    %23 = vector.load %arg4[%c0_18, %c0_19] : memref<8x128xf32, #tpu.memory_space<vmem>>, vector<8x128xf32>
    tpu.vector_store %arg4[%c0_18, %c0_19], %22 {strides = array<i32>} : memref<8x128xf32, #tpu.memory_space<vmem>>, vector<8x128xf32>,
    return
  }
  func.func @transform_0(%arg0: i32) -> (i32, i32) {
    %c0_i32 = arith.constant 0 : i32
    %c0_i32_0 = arith.constant 0 : i32
    return %arg0, %c0_i32 : i32, i32
  }
  func.func @transform_1(%arg0: i32) -> (i32, i32, i32) {
    %c0_i32 = arith.constant 0 : i32
    %c0_i32_0 = arith.constant 0 : i32
    %c0_i32_1 = arith.constant 0 : i32
    %c0_i32_2 = arith.constant 0 : i32
    return %c0_i32, %c0_i32_0, %c0_i32_1 : i32, i32, i32
  }
  func.func @transform_2(%arg0: i32) -> (i32, i32) {
    %c0_i32 = arith.constant 0 : i32
    %c0_i32_0 = arith.constant 0 : i32
    %c0_i32_1 = arith.constant 0 : i32
    return %c0_i32, %c0_i32_0 : i32, i32
  }
  func.func @transform_3(%arg0: i32) -> (i32, i32) {
    %c0_i32 = arith.constant 0 : i32
    %c0_i32_0 = arith.constant 0 : i32
    return %arg0, %c0_i32 : i32, i32
  }
}

</mosaic_0001>

<bundles_post_ra>
// kernel: tpu_custom_call.1
= control target key start
LH: loop header
LB: loop body
LE: loop exit
PB: predicated region body
PF: predicated region fallthrough
CT: control target
= control target key end

     0   :  { %8 = vsyncpa [#allocation3], 0  ;;  %s694_s0 = inlined_call_operand.hbm [shape: f32[8,128], index: 0, kind: input, shape index: {}]   ;;  %s695_s1 = inlined_call_operand.hbm [shape: f32[3,128,128], index: 1, kind: input, shape index: {}]   ;;  %s696_s2 = inlined_call_operand.hbm [shape: f32[8,128], index: 2, kind: input, shape index: {}]   ;;  %s697_s3 = inlined_call_operand.hbm [shape: f32[8,128], index: 3, kind: output, shape index: {}]  }
   0x1   :  { %9 = vsyncpa [#allocation6], 0 }
   0x2   :  { %10 = vsyncpa [#allocation4], 0  ;;  %s600_s12 = smov [#allocation5]  }
   0x3   :  { %s26_s13 = sshll.u32 %s600_s12, 4  ;;  %s27_s13 = int_to_ptr.vmem [resolvable:$true] %s26_s13 }
   0x4   :  { %s522_s14 = scalar_lea.vmem %s27_s13, 6144  ;;  %p527_p1 = scmp.lt.s32.totalorder %s27_s13, %s27_s13 }
   0x5   :  { %p523_p0 = scmp.ne.s32.totalorder %s27_s13, %s522_s14  ;;  %p528_p2 = scmp.lt.s32.totalorder %s522_s14, %s522_s14 }
   0x7   :  { %p529_p3 = por %p528_p2, %p527_p1 }
   0x9   :  { %p530_p4 = pnand %p529_p3, %p523_p0 }
   0xb   :  { %533 = shalt.err (!%p530_p4)
}
   0xc   :  { %s601_s15 = smov 128   ;;  %s602_s16 = smov 8  }
   0xd   :  { %32 = dma.hbm_to_vmem [thread:$0]  %s695_s1, 6144, %s27_s13, [#allocation6], %s601_s15, %s601_s15, %s602_s16  }
   0xe   :  { %s603_s19 = smov [#allocation2]   ;;  %s604_s21 = smov [#allocation7]  }
   0xf   :  { %s17_s20 = sshll.u32 %s603_s19, 4  ;;  %s39_s22 = sshll.u32 %s604_s21, 4  ;;  %s18_s20 = int_to_ptr.vmem [resolvable:$true] %s17_s20  ;;  %s40_s22 = int_to_ptr.vmem [resolvable:$true] %s39_s22 }
  0x10   :  { %s542_s23 = scalar_lea.vmem %s18_s20, 128  ;;  %p547_p6 = scmp.lt.s32.totalorder %s18_s20, %s18_s20 }
  0x11   :  { %p543_p5 = scmp.ne.s32.totalorder %s18_s20, %s542_s23  ;;  %p548_p7 = scmp.lt.s32.totalorder %s542_s23, %s542_s23 }
  0x13   :  { %p549_p8 = por %p548_p7, %p547_p6 }
  0x15   :  { %p550_p9 = pnand %p549_p8, %p543_p5 }
  0x17   :  { %553 = shalt.err (!%p550_p9)
}
  0x18   :  { %20 = dma.hbm_to_vmem [thread:$0]  %s694_s0, 128, %s18_s20, [#allocation3]  }
  0x19   :  { %s562_s26 = scalar_lea.vmem %s40_s22, 128  ;;  %p567_p11 = scmp.lt.s32.totalorder %s40_s22, %s40_s22 }
  0x1a   :  { %p563_p10 = scmp.ne.s32.totalorder %s40_s22, %s562_s26  ;;  %p568_p12 = scmp.lt.s32.totalorder %s562_s26, %s562_s26 }
  0x1c   :  { %p569_p13 = por %p568_p12, %p567_p11 }
  0x1e   :  { %p570_p0 = pnand %p569_p13, %p563_p10 }
  0x20   :  { %573 = shalt.err (!%p570_p0)
}
  0x21   :  { %42 = dma.hbm_to_vmem [thread:$0]  %s696_s2, 128, %s40_s22, [#allocation6]  }
  0x22   :  { %594 = dma.done.wait [#allocation3], 128  }
  0x23   :  { %595 = vsyncadd [#allocation3], 4294967168 }
  0x24   :  { %596 = dma.done.wait [#allocation6], 6272  }
  0x25   :  { %597 = vsyncadd [#allocation6], 4294961024  ;;  %v605_v0 = vmov 0.0   ;;  %vm606_vm0 = vmmov 0   ;;  %v68_v1 = vld [vmem:[#allocation5 + $0x78] sm:$0xff]  ;;  %v67_v2 = vld [vmem:[#allocation5 + $0x70] sm:$0xff] }
  0x26   :  { %401 = vmatprep.subr.mxu0 %v605_v0  ;;  %433 = vmatprep.mubr.msk.f32.mxu0 %vm606_vm0, %v605_v0  ;;  %v66_v3 = vld [vmem:[#allocation5 + $0x68] sm:$0xff]  ;;  %v65_v4 = vld [vmem:[#allocation5 + $0x60] sm:$0xff]  ;;  %v161_v5 = vld [vmem:[#allocation5 + $0xf8] sm:$0xff]  ;;  %s607_s0 = smov [#allocation8]  }
  0x27   :  { %436 = vmatprep.subr.mxu1 %v605_v0  ;;  %468 = vmatprep.mubr.msk.f32.mxu1 %vm606_vm0, %v605_v0  ;;  %v64_v6 = vld [vmem:[#allocation5 + $0x58] sm:$0xff]  ;;  %v160_v7 = vld [vmem:[#allocation5 + $0xf0] sm:$0xff]  ;;  %v159_v8 = vld [vmem:[#allocation5 + $0xe8] sm:$0xff]  ;;  %s337_s2 = sshll.u32 %s607_s0, 4  ;;  %s338_s2 = int_to_ptr.vmem [resolvable:$true] %s337_s2 }
  0x28   :  { %402 = vmatpush3.msra.mxu0 %v68_v1  ;;  %437 = vmatpush3.msra.mxu1 %v161_v5  ;;  %v63_v9 = vld [vmem:[#allocation5 + $0x50] sm:$0xff]  ;;  %v158_v10 = vld [vmem:[#allocation5 + $0xe0] sm:$0xff]  ;;  %v62_v11 = vld [vmem:[#allocation5 + $0x48] sm:$0xff]  ;;  %s574_s28 = scalar_lea.vmem %s338_s2, 128  ;;  %p579_p2 = scmp.lt.s32.totalorder %s338_s2, %s338_s2 }
  0x29   :  { %403 = vmatprep.subr.mxu0 %v605_v0  ;;  %438 = vmatprep.subr.mxu1 %v605_v0  ;;  %v157_v12 = vld [vmem:[#allocation5 + $0xd8] sm:$0xff]  ;;  %v61_v13 = vld [vmem:[#allocation5 + $0x40] sm:$0xff]  ;;  %v156_v14 = vld [vmem:[#allocation5 + $0xd0] sm:$0xff]  ;;  %p575_p1 = scmp.ne.s32.totalorder %s338_s2, %s574_s28  ;;  %p580_p3 = scmp.lt.s32.totalorder %s574_s28, %s574_s28 }
  0x2a   :  { %404 = vmatpush3.msra.mxu0 %v67_v2  ;;  %439 = vmatpush3.msra.mxu1 %v160_v7  ;;  %v60_v15 = vld [vmem:[#allocation5 + $0x38] sm:$0xff]  ;;  %v155_v16 = vld [vmem:[#allocation5 + $0xc8] sm:$0xff]  ;;  %v59_v17 = vld [vmem:[#allocation5 + $0x30] sm:$0xff] }
  0x2b   :  { %405 = vmatprep.subr.mxu0 %v605_v0  ;;  %440 = vmatprep.subr.mxu1 %v605_v0  ;;  %v154_v18 = vld [vmem:[#allocation5 + $0xc0] sm:$0xff]  ;;  %v58_v19 = vld [vmem:[#allocation5 + $0x28] sm:$0xff]  ;;  %v153_v20 = vld [vmem:[#allocation5 + $0xb8] sm:$0xff]  ;;  %p581_p4 = por %p580_p3, %p579_p2 }
  0x2c   :  { %406 = vmatpush3.msra.mxu0 %v66_v3  ;;  %441 = vmatpush3.msra.mxu1 %v159_v8  ;;  %v57_v21 = vld [vmem:[#allocation5 + $0x20] sm:$0xff]  ;;  %v152_v22 = vld [vmem:[#allocation5 + $0xb0] sm:$0xff]  ;;  %v56_v23 = vld [vmem:[#allocation5 + $0x18] sm:$0xff] }
  0x2d   :  { %407 = vmatprep.subr.mxu0 %v605_v0  ;;  %442 = vmatprep.subr.mxu1 %v605_v0  ;;  %v151_v24 = vld [vmem:[#allocation5 + $0xa8] sm:$0xff]  ;;  %v55_v25 = vld [vmem:[#allocation5 + $0x10] sm:$0xff]  ;;  %v150_v26 = vld [vmem:[#allocation5 + $0xa0] sm:$0xff]  ;;  %p582_p5 = pnand %p581_p4, %p575_p1 }
  0x2e   :  { %408 = vmatpush3.msra.mxu0 %v65_v4  ;;  %443 = vmatpush3.msra.mxu1 %v158_v10  ;;  %v54_v27 = vld [vmem:[#allocation5 + $0x8] sm:$0xff]  ;;  %v149_v28 = vld [vmem:[#allocation5 + $0x98] sm:$0xff]  ;;  %v53_v29 = vld [vmem:[#allocation5] sm:$0xff] }
  0x2f   :  { %409 = vmatprep.subr.mxu0 %v605_v0  ;;  %444 = vmatprep.subr.mxu1 %v605_v0  ;;  %v52_v30 = vld [vmem:[#allocation2] sm:$0xff]  ;;  %v148_v31 = vld [vmem:[#allocation5 + $0x90] sm:$0xff]  ;;  %v147_v32 = vld [vmem:[#allocation5 + $0x88] sm:$0xff] }
  0x30   :  { %410 = vmatpush3.msra.mxu0 %v64_v6  ;;  %445 = vmatpush3.msra.mxu1 %v157_v12  ;;  %v146_v33 = vld [vmem:[#allocation5 + $0x80] sm:$0xff]  ;;  %v254_v34 = vld [vmem:[#allocation5 + $0x178] sm:$0xff]  ;;  %v253_v35 = vld [vmem:[#allocation5 + $0x170] sm:$0xff] }
  0x31   :  { %411 = vmatprep.subr.mxu0 %v605_v0  ;;  %446 = vmatprep.subr.mxu1 %v605_v0  ;;  %v252_v36 = vld [vmem:[#allocation5 + $0x168] sm:$0xff]  ;;  %v251_v37 = vld [vmem:[#allocation5 + $0x160] sm:$0xff]  ;;  %v250_v38 = vld [vmem:[#allocation5 + $0x158] sm:$0xff] }
  0x32   :  { %412 = vmatpush3.msra.mxu0 %v63_v9  ;;  %447 = vmatpush3.msra.mxu1 %v156_v14  ;;  %v249_v39 = vld [vmem:[#allocation5 + $0x150] sm:$0xff]  ;;  %v248_v40 = vld [vmem:[#allocation5 + $0x148] sm:$0xff]  ;;  %v247_v41 = vld [vmem:[#allocation5 + $0x140] sm:$0xff] }
  0x33   :  { %413 = vmatprep.subr.mxu0 %v605_v0  ;;  %448 = vmatprep.subr.mxu1 %v605_v0  ;;  %v246_v42 = vld [vmem:[#allocation5 + $0x138] sm:$0xff]  ;;  %v245_v43 = vld [vmem:[#allocation5 + $0x130] sm:$0xff]  ;;  %v244_v44 = vld [vmem:[#allocation5 + $0x128] sm:$0xff] }
  0x34   :  { %414 = vmatpush3.msra.mxu0 %v62_v11  ;;  %449 = vmatpush3.msra.mxu1 %v155_v16  ;;  %v243_v45 = vld [vmem:[#allocation5 + $0x120] sm:$0xff]  ;;  %v242_v46 = vld [vmem:[#allocation5 + $0x118] sm:$0xff]  ;;  %v241_v52 = vld [vmem:[#allocation5 + $0x110] sm:$0xff] }
  0x35   :  { %415 = vmatprep.subr.mxu0 %v605_v0  ;;  %450 = vmatprep.subr.mxu1 %v605_v0  ;;  %v347_v47 = vld [vmem:[#allocation7] ss:$0 sm:$0xff]  ;;  %v240_v53 = vld [vmem:[#allocation5 + $0x108] sm:$0xff]  ;;  %v348_v55 = vld [vmem:[#allocation7 + $0x1] ss:$0 sm:$0xff] }
  0x36   :  { %416 = vmatpush3.msra.mxu0 %v61_v13  ;;  %451 = vmatpush3.msra.mxu1 %v154_v18  ;;  %v239_v54 = vld [vmem:[#allocation5 + $0x100] sm:$0xff] }
  0x37   :  { %417 = vmatprep.subr.mxu0 %v605_v0  ;;  %452 = vmatprep.subr.mxu1 %v605_v0  ;;  %v349_v60 = vld [vmem:[#allocation7 + $0x2] ss:$0 sm:$0xff] }
  0x38   :  { %418 = vmatpush3.msra.mxu0 %v60_v15  ;;  %453 = vmatpush3.msra.mxu1 %v153_v20 }
  0x39   :  { %419 = vmatprep.subr.mxu0 %v605_v0  ;;  %454 = vmatprep.subr.mxu1 %v605_v0 }
  0x3a   :  { %420 = vmatpush3.msra.mxu0 %v59_v17  ;;  %455 = vmatpush3.msra.mxu1 %v152_v22 }
  0x3b   :  { %421 = vmatprep.subr.mxu0 %v605_v0  ;;  %456 = vmatprep.subr.mxu1 %v605_v0 }
  0x3c   :  { %422 = vmatpush3.msra.mxu0 %v58_v19  ;;  %457 = vmatpush3.msra.mxu1 %v151_v24 }
  0x3d   :  { %423 = vmatprep.subr.mxu0 %v605_v0  ;;  %458 = vmatprep.subr.mxu1 %v605_v0 }
  0x3e   :  { %424 = vmatpush3.msra.mxu0 %v57_v21  ;;  %459 = vmatpush3.msra.mxu1 %v150_v26 }
  0x3f   :  { %425 = vmatprep.subr.mxu0 %v605_v0  ;;  %460 = vmatprep.subr.mxu1 %v605_v0 }
  0x40   :  { %426 = vmatpush3.msra.mxu0 %v56_v23  ;;  %461 = vmatpush3.msra.mxu1 %v149_v28 }
  0x41   :  { %427 = vmatprep.subr.mxu0 %v605_v0  ;;  %462 = vmatprep.subr.mxu1 %v605_v0 }
  0x42   :  { %428 = vmatpush3.msra.mxu0 %v55_v25  ;;  %463 = vmatpush3.msra.mxu1 %v148_v31 }
  0x43   :  { %429 = vmatprep.subr.mxu0 %v605_v0  ;;  %464 = vmatprep.subr.mxu1 %v605_v0 }
  0x44   :  { %430 = vmatpush3.msra.mxu0 %v54_v27  ;;  %465 = vmatpush3.msra.mxu1 %v147_v32 }
  0x45   :  { %431 = vmatprep.subr.mxu0 %v605_v0  ;;  %466 = vmatprep.subr.mxu1 %v605_v0 }
  0x46   :  { %432 = vmatpush3.msra.mxu0 %v53_v29  ;;  %467 = vmatpush3.msra.mxu1 %v146_v33 }
  0x47   :  { %434 = vmatmul.mubr.f32.vlgmr.msra.gmra.mxu0 %v52_v30  ;;  %471 = vmatprep.subr.mxu0 %v605_v0 }
  0x48   :  { %503 = vmatprep.mubr.msk.f32.mxu0 %vm606_vm0, %v605_v0  ;;  %472 = vmatpush3.msra.mxu0 %v254_v34 }
  0x49   :  { %473 = vmatprep.subr.mxu0 %v605_v0 }
  0x4a   :  { %474 = vmatpush3.msra.mxu0 %v253_v35 }
  0x4b   :  { %475 = vmatprep.subr.mxu0 %v605_v0 }
  0x4c   :  { %476 = vmatpush3.msra.mxu0 %v252_v36 }
  0x4d   :  { %477 = vmatprep.subr.mxu0 %v605_v0 }
  0x4e   :  { %478 = vmatpush3.msra.mxu0 %v251_v37 }
  0x4f   :  { %479 = vmatprep.subr.mxu0 %v605_v0 }
  0x50   :  { %480 = vmatpush3.msra.mxu0 %v250_v38 }
  0x51   :  { %481 = vmatprep.subr.mxu0 %v605_v0 }
  0x52   :  { %482 = vmatpush3.msra.mxu0 %v249_v39 }
  0x53   :  { %483 = vmatprep.subr.mxu0 %v605_v0 }
  0x54   :  { %484 = vmatpush3.msra.mxu0 %v248_v40 }
  0x55   :  { %485 = vmatprep.subr.mxu0 %v605_v0 }
  0x56   :  { %486 = vmatpush3.msra.mxu0 %v247_v41 }
  0x57   :  { %487 = vmatprep.subr.mxu0 %v605_v0 }
  0x58   :  { %488 = vmatpush3.msra.mxu0 %v246_v42 }
  0x59   :  { %489 = vmatprep.subr.mxu0 %v605_v0 }
  0x5a   :  { %490 = vmatpush3.msra.mxu0 %v245_v43 }
  0x5b   :  { %491 = vmatprep.subr.mxu0 %v605_v0 }
  0x5c   :  { %492 = vmatpush3.msra.mxu0 %v244_v44 }
  0x5d   :  { %493 = vmatprep.subr.mxu0 %v605_v0 }
  0x5e   :  { %494 = vmatpush3.msra.mxu0 %v243_v45 }
  0x5f   :  { %495 = vmatprep.subr.mxu0 %v605_v0 }
  0x60   :  { %496 = vmatpush3.msra.mxu0 %v242_v46 }
  0x61   :  { %497 = vmatprep.subr.mxu0 %v605_v0 }
  0x62   :  { %498 = vmatpush3.msra.mxu0 %v241_v52 }
  0x63   :  { %499 = vmatprep.subr.mxu0 %v605_v0 }
  0x64   :  { %500 = vmatpush3.msra.mxu0 %v240_v53 }
  0x65   :  { %501 = vmatprep.subr.mxu0 %v605_v0 }
  0x66   :  { %502 = vmatpush3.msra.mxu0 %v239_v54 }
 0x107   :  { %v140_v48 = vpop.f32.mrf.mxu0 }
 0x108   :  { %v141_v49 = vadd.f32 %v347_v47, %v140_v48 }
 0x109   :  { %v435_v50 = vpop.f32.mrf.mxu0 }
 0x10a   :  { %v144_v51 = vmax.f32 %v141_v49, 0.0 }
 0x10c   :  { %469 = vmatmul.mubr.f32.vlgmr.msra.gmra.mxu1 %v144_v51 }
 0x1cc   :  { %v233_v56 = vpop.f32.mrf.mxu1 }
 0x1cd   :  { %v234_v57 = vadd.f32 %v348_v55, %v233_v56 }
 0x1ce   :  { %v470_v58 = vpop.f32.mrf.mxu1 }
 0x1cf   :  { %v237_v59 = vmax.f32 %v234_v57, 0.0 }
 0x1d1   :  { %504 = vmatmul.mubr.f32.vlgmr.msra.gmra.mxu0 %v237_v59 }
 0x291   :  { %v326_v61 = vpop.f32.mrf.mxu0 }
 0x292   :  { %v327_v62 = vadd.f32 %v349_v60, %v326_v61 }
 0x293   :  { %v505_v63 = vpop.f32.mrf.mxu0 }
 0x294   :  { %330 = vst [vmem:[#allocation8] sm:$0xff] %v327_v62 }
 0x295   :  { %585 = shalt.err (!%p582_p5)
}
 0x296   :  { %340 = dma.vmem_to_hbm [thread:$0]  %s338_s2, 128, %s697_s3, [#allocation4]  }
 0x297   :  { %598 = dma.done.wait [#allocation4], 128  }
 0x298   :  { %599 = vsyncadd [#allocation4], 4294967168 }
 0x299   :  { %344 = vsyncpa [#allocation3], 1 }
 0x29a   :  { %345 = vsyncpa [#allocation6], 1 }
 0x29b   :  { %346 = vsyncpa [#allocation4], 1 }

</bundles_post_ra>
